<compile_context>
chip_gen: v6e
topology: v6e:2x2x1
jax: 0.10.0
libtpu: 0.0.40
codegen_flags: <defaults>
</compile_context>

<pallas_src>
import jax
import jax.numpy as jnp
from jax.experimental import pallas as pl
from jax.experimental.pallas import tpu as pltpu


def _bias_add_kernel(x_ref, b_ref, o_ref):
    # x_ref: (tile_rows, D) slab, b_ref: (1, D) resident bias; broadcast add
    # runs entirely on the VPU (elementwise, lane-aligned).
    o_ref[...] = x_ref[...] + b_ref[...]


def _pick_tile_rows(m, d, itemsize, *, target_rows=1024, vmem_budget=16 << 20):
    """Largest divisor of m (sublane-aligned if possible) fitting the VMEM budget.

    Per tile the pipeline keeps roughly:
      2 * (tm * d)  x-input buffers  (double-buffered)
      2 * (tm * d)  output buffers   (double-buffered)
      2 * (1  * d)  bias buffers
    """
    def fits(tm):
        return (4 * tm * d + 2 * d) * itemsize <= vmem_budget

    if m <= target_rows and fits(m):
        return m
    # Prefer sublane-aligned (multiple of 8) divisors, largest first.
    best = None
    for tm in range(min(m, target_rows), 0, -1):
        if m % tm == 0 and fits(tm):
            if tm % 8 == 0:
                return tm
            if best is None:
                best = tm
    if best is not None:
        return best
    return m  # degenerate fallback: single full-height block


def bias_add(x, bias, *, block_rows=None):
    """Pallas equivalent of `x + bias` where bias has shape (x.shape[-1],)."""
    orig_shape = x.shape
    d = int(orig_shape[-1])
    m = 1
    for s in orig_shape[:-1]:
        m *= int(s)

    # Free, row-major reshapes (no data movement): lane-dense (M, D) layout.
    x2 = x.reshape(m, d)
    b2 = bias.reshape(1, d).astype(x.dtype)

    itemsize = jnp.dtype(x.dtype).itemsize
    if block_rows is None:
        tm = _pick_tile_rows(m, d, itemsize)
    else:
        tm = _pick_tile_rows(m, d, itemsize, target_rows=int(block_rows))
    grid = (m // tm,)

    cost = pl.CostEstimate(
        flops=m * d,
        transcendentals=0,
        bytes_accessed=2 * m * d * itemsize + d * itemsize,
    )

    out2 = pl.pallas_call(
        _bias_add_kernel,
        out_shape=jax.ShapeDtypeStruct((m, d), x.dtype),
        grid_spec=pltpu.PrefetchScalarGridSpec(
            num_scalar_prefetch=0,
            grid=grid,
            in_specs=[
                # Row tile i of x.
                pl.BlockSpec((tm, d), lambda i: (i, 0)),
                # Bias: constant block index -> fetched once, stays in VMEM.
                pl.BlockSpec((1, d), lambda i: (0, 0)),
            ],
            out_specs=pl.BlockSpec((tm, d), lambda i: (i, 0)),
        ),
        compiler_params=pltpu.CompilerParams(
            dimension_semantics=("parallel",),
        ),
        cost_estimate=cost,
    )(x2, b2)

    return out2.reshape(orig_shape)


if __name__ == "__main__":
    key = jax.random.PRNGKey(0)
    k_x, k_b = jax.random.split(key)

    # Small, TPU-tile-friendly shapes: batch=2, seq=8, hidden=128.
    B, N, D = 2, 8, 128
    x = jax.random.normal(k_x, (B, N, D), dtype=jnp.float32)

    # The module initializes bias to zeros; use random values here so the
    # correctness check actually exercises the broadcast add.
    bias = jax.random.normal(k_b, (D,), dtype=jnp.float32)

    # block_rows=8 so the demo runs a multi-step grid (M=16 -> grid=(2,)).
    out = bias_add(x, bias, block_rows=8)
    out = jax.block_until_ready(out)

    ref = x + bias
    assert out.shape == ref.shape and out.dtype == ref.dtype
    assert jnp.allclose(out, ref)

    print("KERNEL_OK")
</pallas_src>

<mosaic_0001>
module attributes {stable_mosaic.version = 11 : i64} {
  func.func @_bias_add_kernel(%arg0: i32, %arg1: memref<8x128xf32, #tpu.memory_space<vmem>>, %arg2: memref<1x128xf32, #tpu.memory_space<vmem>>, %arg3: memref<8x128xf32, #tpu.memory_space<vmem>>) attributes {dimension_semantics = [#tpu.dimension_semantics<parallel>], iteration_bounds = array<i64: 2>, scalar_prefetch = 0 : i64, scratch_operands = 0 : i64, tpu.core_type = #tpu.core_type<tc>, window_params = [{transform_indices = @transform_0, window_bounds = array<i64: 8, 128>}, {pipeline_mode = #tpu.pipeline_mode<synchronous>, transform_indices = @transform_1, window_bounds = array<i64: 1, 128>}, {transform_indices = @transform_2, window_bounds = array<i64: 8, 128>}]} {
    %c0 = arith.constant 0 : index
    %c0_0 = arith.constant 0 : index
    %0 = vector.load %arg1[%c0, %c0_0] : memref<8x128xf32, #tpu.memory_space<vmem>>, vector<8x128xf32>
    %c0_1 = arith.constant 0 : index
    %c0_2 = arith.constant 0 : index
    %1 = vector.load %arg2[%c0_1, %c0_2] : memref<1x128xf32, #tpu.memory_space<vmem>>, vector<1x128xf32>
    %2 = vector.broadcast %1 : vector<1x128xf32> to vector<8x128xf32>
    %3 = arith.addf %0, %2 : vector<8x128xf32>
    %c0_3 = arith.constant 0 : index
    %c0_4 = arith.constant 0 : index
    %4 = vector.load %arg3[%c0_3, %c0_4] : memref<8x128xf32, #tpu.memory_space<vmem>>, vector<8x128xf32>
    tpu.vector_store %arg3[%c0_3, %c0_4], %3 {strides = array<i32>} : memref<8x128xf32, #tpu.memory_space<vmem>>, vector<8x128xf32>,
    return
  }
  func.func @transform_0(%arg0: i32) -> (i32, i32) {
    %c0_i32 = arith.constant 0 : i32
    %c0_i32_0 = arith.constant 0 : i32
    return %arg0, %c0_i32 : i32, i32
  }
  func.func @transform_1(%arg0: i32) -> (i32, i32) {
    %c0_i32 = arith.constant 0 : i32
    %c0_i32_0 = arith.constant 0 : i32
    %c0_i32_1 = arith.constant 0 : i32
    return %c0_i32, %c0_i32_0 : i32, i32
  }
  func.func @transform_2(%arg0: i32) -> (i32, i32) {
    %c0_i32 = arith.constant 0 : i32
    %c0_i32_0 = arith.constant 0 : i32
    return %arg0, %c0_i32 : i32, i32
  }
}

</mosaic_0001>

<bundles_post_ra>
// kernel: tpu_custom_call.1
= control target key start
LH: loop header
LB: loop body
LE: loop exit
PB: predicated region body
PF: predicated region fallthrough
CT: control target
= control target key end

     0   :  { %7 = vsyncpa [#allocation3], 0  ;;  %s567_s0 = inlined_call_operand.hbm [shape: f32[16,128], index: 0, kind: input, shape index: {}]   ;;  %s568_s1 = inlined_call_operand.vmem [shape: f32[1,128], index: 1, kind: input, shape index: {}]   ;;  %s569_s2 = inlined_call_operand.hbm [shape: f32[16,128], index: 2, kind: output, shape index: {}]  }
   0x1   :  { %9 = vsyncpa [#allocation3 + $0x1], 0 }
   0x2   :  { %10 = vsyncpa [#allocation4], 0 }
   0x3   :  { %12 = vsyncpa [#allocation4 + $0x1], 0  ;;  %s423_s9 = smov 0   ;;  %s425_s10 = smov 0  }
   0x4   :  { %s427_s11 = smov 0   ;;  %s429_s12 = smov 0  }
   0x5 LB: > { %s444_s13 = sadd.s32 4294967295, %s404_s12   ;;  %s253_s14 = sadd.s32 4294967294, %s404_s12   ;;  %s404_s12 = sphi %s429_s12, %s586_s12   ;;  %s400_s11 = sphi %s427_s11, %s585_s11   ;;  %s396_s10 = sphi %s425_s10, %s584_s10   ;;  %s392_s9 = sphi %s423_s9, %s583_s9  }
   0x6   : > { %s448_s15 = sadd.s32 1, %s404_s12   ;;  %s25_s16 = sadd.s32 1, %s400_s11 }
   0x7   : > { %s22_s17 = ssub.s32 %s404_s12, %s448_s15  ;;  %p32_p0 = scmp.ne.s32.totalorder %s400_s11, %s396_s10 }
   0x8   : > { %p23_p1 = scmp.eq.s32.totalorder %s22_s17, 0  ;;  %p33_p2 = scmp.eq.s32.totalorder %s404_s12, 0 }
   0x9   : > { %p38_p3 = scmp.ne.s32.totalorder %s396_s10, %s392_s9  ;;  %p39_p4 = scmp.eq.s32.totalorder %s444_s13, 0 }
   0xa   : > { %s460_s18 = scalar_select %p23_p1, %s400_s11, %s25_s16  }
   0xb   : > { %p462_p5 = por %p33_p2, %p32_p0  ;;  %p466_p6 = por %p39_p4, %p38_p3 }
   0xc   : > { %p83_p7 = scmp.eq.s32.totalorder %s444_s13, 1  ;;  %p89_p8 = scmp.eq.s32.totalorder %s253_s14, 1 }
   0xd   : > { %s573_s20 = scalar_select %p466_p6, 1, 0 }
   0xe   : > { %p278_p10 = scmp.lt.s32.totalorder %s404_s12, 2  ;;  %p473_p11 = por %p83_p7, %p32_p0 }
   0xf   : > { %p477_p12 = por %p89_p8, %p38_p3  ;;  %s112_s23 = sand.u32 1, %s400_s11  }
  0x10   : > { %s574_s21 = scalar_select %p473_p11, 1, 0 }
  0x11   : > { %s575_s22 = scalar_select %p477_p12, 1, 0 }
  0x12   : > { %s257_s24 = sshll.u32 %s404_s12, 7  ;;  %s256_s25 = sshll.u32 %s112_s23, 3 }
  0x13   : > { %s486_s28 = scalar_lea.hbm %s567_s0, %s257_s24  ;;  %s116_s29 = scalar_lea.vmem [#allocation2], %s256_s25 }
  0x14   : > { %s123_s30 = sshll.u32 %s116_s29, 4  ;;  %p490_p13 = pnand %p278_p10, %p462_p5  ;;  %s494_s30 = int_to_ptr.vmem [resolvable:$true] %s123_s30 }
  0x15   : > { %s113_s4 = scalar_lea.sflag [#allocation3], %s112_s23  ;;  %s312_s5 = scalar_lea.hbm %s486_s28, 128 }
  0x16   : > { %p313_p2 = scmp.ne.s32.totalorder %s486_s28, %s312_s5  ;;  %p314_p3 = pneg %p490_p13 }
  0x17   : > { %s317_s8 = scalar_lea.hbm %s567_s0, 256  ;;  %p318_p5 = scmp.lt.s32.totalorder %s486_s28, %s567_s0 }
  0x18   : > { %p315_p4 = pnand %p314_p3, %p313_p2  ;;  %p319_p8 = scmp.lt.s32.totalorder %s317_s8, %s312_s5 }
  0x1a   : > { %p316_p7 = pneg %p315_p4  ;;  %p320_p10 = por %p319_p8, %p318_p5 }
  0x1c   : > { %p321_p9 = pnand %p320_p10, %p316_p7 }
  0x1e   : > { %324 = shalt.err (!%p321_p9)
}
  0x1f   : > { %s325_s17 = scalar_lea.vmem %s494_s30, 128  ;;  %s406_s19 = smov [#allocation2]  }
  0x20   : > { %p326_p0 = scmp.ne.s32.totalorder %s494_s30, %s325_s17  ;;  %s330_s23 = sshll.u32 %s406_s19, 4  ;;  %s331_s23 = int_to_ptr.vmem [resolvable:$false] %s330_s23 }
  0x21   : > { %s332_s24 = scalar_lea.vmem %s331_s23, 256  ;;  %p333_p4 = scmp.lt.s32.totalorder %s494_s30, %s331_s23 }
  0x22   : > { %p328_p1 = pnand %p326_p0, %p314_p3  ;;  %p334_p12 = scmp.lt.s32.totalorder %s332_s24, %s325_s17 }
  0x24   : > { %p329_p2 = pneg %p328_p1  ;;  %p335_p11 = por %p334_p12, %p333_p4 }
  0x26   : > { %p336_p6 = pnand %p335_p11, %p329_p2 }
  0x28   : > { %339 = shalt.err (!%p336_p6)
}
  0x29   : > { %273 = dma.hbm_to_vmem [thread:$0]  (!%p490_p13), %s486_s28, 128, %s494_s30, %s113_s4  }
  0x2a   : > { %p577_p9 = scmp.lt.s32.totalorder %s404_s12, 3  ;;  %p578_p7 = scmp.ge.s32.totalorder %s404_s12, 1 }
  0x2c   : > { %p129_p0 = pnand %p578_p7, %p577_p9 }
  0x2d   : > { %s521_s25 = sand.u32 (!%p129_p0), 1, %s396_s10   ;;  %p579_p6 = scmp.ne.s32.totalorder (!%p129_p0), %s573_s20, 0 }
  0x2e   : > { %132 = sbr.rel (%p129_p0) target bundleno = 77 (0x4d), region = 28  ;;  %s259_s26 = sshll.u32 (!%p129_p0), %s521_s25, 3 }
  0x2f   : > { %s135_s27 = scalar_lea.sflag (!%p129_p0), [#allocation3], %s521_s25  ;;  %s138_s29 = scalar_lea.vmem (!%p129_p0), [#allocation2], %s259_s26 }
  0x33   : > { %383 = dma.done.wait (%p579_p6), %s135_s27, 128  }
  0x34   : > { %385 = vsyncadd (%p579_p6), %s135_s27, 4294967168  ;;  %s158_s28 = scalar_lea.vmem [#allocation5], %s259_s26  ;;  %s263_s3 = sshll.u32 %s444_s13, 7  ;;  %v159_v0 = vld [vmem:[%s138_s29] sm:$0xff] }
  0x35   : > { %s183_s30 = sshll.u32 %s158_s28, 4  ;;  %v261_v1 = vld [vmem:[%s568_s1] ss:$0 sm:$0xff]  ;;  %s181_s8 = scalar_lea.hbm %s569_s2, %s263_s3  ;;  %s184_s30 = int_to_ptr.vmem [resolvable:$true] %s183_s30 }
  0x36   : > { %v167_v2 = vadd.f32 %v261_v1, %v159_v0  ;;  %s170_s20 = scalar_lea.sflag [#allocation4], %s521_s25  ;;  %s340_s14 = scalar_lea.vmem %s184_s30, 128 }
  0x37   : > { %p341_p11 = scmp.ne.s32.totalorder %s184_s30, %s340_s14  ;;  %p580_p12 = scmp.ne.s32.totalorder %s574_s21, 0 }
  0x38   : > { %168 = vst [vmem:[%s158_s28] sm:$0xff] %v167_v2  ;;  %s407_s16 = smov [#allocation5]  }
  0x39   : > { %p342_p13 = pnand %p341_p11, %p580_p12  ;;  %s344_s13 = sshll.u32 %s407_s16, 4  ;;  %s345_s13 = int_to_ptr.vmem [resolvable:$false] %s344_s13 }
  0x3a   : > { %s346_s17 = scalar_lea.vmem %s345_s13, 256  ;;  %p347_p3 = scmp.lt.s32.totalorder %s184_s30, %s345_s13 }
  0x3b   : > { %p343_p1 = pneg %p342_p13  ;;  %p348_p5 = scmp.lt.s32.totalorder %s346_s17, %s340_s14 }
  0x3d   : > { %p349_p8 = por %p348_p5, %p347_p3 }
  0x3f   : > { %p350_p10 = pnand %p349_p8, %p343_p1 }
  0x41   : > { %353 = shalt.err (!%p350_p10)
}
  0x42   : > { %s354_s19 = scalar_lea.hbm %s181_s8, 128  ;;  %s358_s25 = scalar_lea.hbm %s569_s2, 256 }
  0x43   : > { %p355_p2 = scmp.ne.s32.totalorder %s181_s8, %s354_s19  ;;  %p359_p7 = scmp.lt.s32.totalorder %s181_s8, %s569_s2 }
  0x44   : > { %p360_p0 = scmp.lt.s32.totalorder %s358_s25, %s354_s19 }
  0x45   : > { %p356_p4 = pnand %p355_p2, %p580_p12 }
  0x46   : > { %p361_p6 = por %p360_p0, %p359_p7 }
  0x47   : > { %p357_p9 = pneg %p356_p4 }
  0x49   : > { %p362_p11 = pnand %p361_p6, %p357_p9 }
  0x4b   : > { %365 = shalt.err (!%p362_p11)
}
  0x4c   : > { %268 = dma.vmem_to_hbm [thread:$0]  (%p580_p12), %s184_s30, 128, %s181_s8, %s170_s20  }
  0x4d PF: > { %s195_s29 = sand.u32 1, %s392_s9   ;;  %p581_p13 = scmp.ne.s32.totalorder %s575_s22, 0 }
  0x4e   : > { %p582_p1 = scmp.ge.s32.totalorder %s404_s12, 2  ;;  %s196_s28 = scalar_lea.sflag [#allocation4], %s195_s29 }
  0x50   : > { %p275_p3 = pnand %p582_p1, %p581_p13 }
  0x52   : > { %p276_p5 = pneg %p275_p3 }
  0x54   : > { %387 = dma.done.wait (%p276_p5), %s196_s28, 128  }
  0x55   : > { %389 = vsyncadd (%p276_p5), %s196_s28, 4294967168  ;;  %p15_p8 = scmp.ge.s32.totalorder %s448_s15, 4   ;;  %s583_s9 = smov %s396_s10 }
  0x56   : > { %s584_s10 = smov %s400_s11  ;;  %s585_s11 = smov %s460_s18 }
  0x57   : > { %s586_s12 = smov %s448_s15  ;;  %17 = sbr.rel (!%p15_p8) target bundleno = 5 (0x5), region = 73 }
  0x5c   :  { %201 = vsyncpa [#allocation3], 1 }
  0x5d   :  { %203 = vsyncpa [#allocation3 + $0x1], 1 }
  0x5e   :  { %204 = vsyncpa [#allocation4], 1 }
  0x5f   :  { %206 = vsyncpa [#allocation4 + $0x1], 1 }

</bundles_post_ra>
